<compile_context>
chip_gen: v7x
topology: tpu7x:2x2x1
jax: 0.10.0
libtpu: 0.0.40
codegen_flags: <defaults>
</compile_context>

<pallas_src>
import functools

import jax
import jax.numpy as jnp
from jax.experimental import pallas as pl
from jax.experimental.pallas import tpu as pltpu


_COORD_PAD = 8  # pad xyz channel dim 3 -> 8 so the distance matmul is tile-aligned


# ----------------------------- in-kernel helpers -----------------------------

def _row_softmax(s):
    """Softmax along the last dim; reciprocal-multiply instead of divide."""
    m = jnp.max(s, axis=-1, keepdims=True)
    e = jnp.exp(s - m)
    return e * pl.reciprocal(jnp.sum(e, axis=-1, keepdims=True), approx=True)


def _pos_col_stats(x3t):
    """Per-column squared norms and 1/(1e-9 + column sums of pairwise sq. distances).

    x3t: (Cp, N) zero-padded coordinates (only first 3 rows nonzero).
    colsum_j = sum_i ||x_i||^2 + N*||x_j||^2 - 2*(sum_i x_i).x_j  -- O(N) total.
    """
    n = x3t.shape[1]
    cn = jnp.sum(x3t * x3t, axis=0, keepdims=True)              # (1, N)
    s = jnp.sum(x3t, axis=1, keepdims=True)                     # (Cp, 1)
    sdot = jnp.sum(s * x3t, axis=0, keepdims=True)              # (1, N)
    col_dist = jnp.sum(cn, axis=1, keepdims=True) + n * cn - 2.0 * sdot
    # Exact (non-approx) reciprocal: this value feeds the <= pos_coef threshold.
    inv_cd = 1.0 / (1e-9 + col_dist)
    return cn, inv_cd


def _dist_rows(p_rows, x3t, cn):
    """Pairwise squared distances of a row tile against all points, on the MXU."""
    rn = jnp.sum(p_rows * p_rows, axis=-1, keepdims=True)                 # (TM, 1)
    cross = jnp.dot(p_rows, x3t, preferred_element_type=jnp.float32)      # (TM, N)
    return jnp.maximum(rn + cn - 2.0 * cross, 0.0)


# ------------------------------ kernel bodies --------------------------------

def _self_attention_single_kernel(w_ref, x_ref, xyz_ref, xyzt_ref, out_ref, *, pos_coef):
    # Shared-weight q/k projection (bf16 operands, f32 accumulation on the MXU).
    q = jnp.dot(w_ref[...], x_ref[0],
                preferred_element_type=jnp.float32).astype(jnp.bfloat16)       # (C4, N)
    corr = jax.lax.dot_general(q, q, (((0,), (0,)), ((), ())),
                               preferred_element_type=jnp.float32)             # (N, N)
    att = _row_softmax(corr)
    att = att * pl.reciprocal(1e-9 + jnp.sum(att, axis=0, keepdims=True), approx=True)

    x3t = xyzt_ref[0]                                                          # (Cp, N)
    cn, inv_cd = _pos_col_stats(x3t)
    dist = _dist_rows(xyz_ref[0], x3t, cn)
    local = jnp.where(dist * inv_cd <= pos_coef, att, 0.0)
    local = _row_softmax(local)
    local = local * pl.reciprocal(1e-9 + jnp.sum(local, axis=0, keepdims=True),
                                  approx=True)

    out_ref[0] = (att + local).astype(out_ref.dtype)


def _self_attention_tiled_kernel(w_ref, x_ref, xcol_ref, xyzr_ref, xyzt_ref, out_ref,
                                 q_ref, colatt_ref, collocal_ref, cn_ref, invcd_ref,
                                 *, pos_coef):
    p = pl.program_id(1)    # 0: att column sums, 1: local column sums, 2: write output
    it = pl.program_id(2)   # row tile index

    @pl.when(jnp.logical_and(p == 0, it == 0))
    def _per_batch_setup():
        # q = W @ x, kept resident for the whole batch (RHS of every corr matmul).
        q_ref[...] = jnp.dot(w_ref[...], x_ref[0],
                             preferred_element_type=jnp.float32).astype(q_ref.dtype)
        colatt_ref[...] = jnp.zeros_like(colatt_ref)
        collocal_ref[...] = jnp.zeros_like(collocal_ref)
        cn, inv_cd = _pos_col_stats(xyzt_ref[0])
        cn_ref[...] = cn
        invcd_ref[...] = inv_cd

    # Row-softmax'ed correlation for this row tile (recomputed each pass; only the
    # O(N) column sums are carried in VMEM, keeping the working set O(TM * N)).
    q_tile = jnp.dot(w_ref[...], xcol_ref[0],
                     preferred_element_type=jnp.float32).astype(jnp.bfloat16)  # (C4, TM)
    corr = jax.lax.dot_general(q_tile, q_ref[...], (((0,), (0,)), ((), ())),
                               preferred_element_type=jnp.float32)             # (TM, N)
    att_soft = _row_softmax(corr)

    @pl.when(p == 0)
    def _accum_att_colsum():
        colatt_ref[...] += jnp.sum(att_soft, axis=0, keepdims=True)

    @pl.when(p > 0)
    def _local_branch():
        att = att_soft * pl.reciprocal(1e-9 + colatt_ref[...], approx=True)
        dist = _dist_rows(xyzr_ref[0], xyzt_ref[0], cn_ref[...])
        local = jnp.where(dist * invcd_ref[...] <= pos_coef, att, 0.0)
        local = _row_softmax(local)

        @pl.when(p == 1)
        def _accum_local_colsum():
            collocal_ref[...] += jnp.sum(local, axis=0, keepdims=True)

        @pl.when(p == 2)
        def _write():
            inv_cl = pl.reciprocal(1e-9 + collocal_ref[...], approx=True)
            out_ref[0] = (att + local * inv_cl).astype(out_ref.dtype)


# --------------------------------- wrapper ------------------------------------

def _vmem_capacity_bytes():
    try:
        cap = getattr(pltpu.get_tpu_info(), "vmem_capacity_bytes", None)
        if cap:
            return int(cap)
    except Exception:
        pass
    return 64 * 1024 * 1024   # conservative default (v7x-sized VMEM)


def _pick_row_tile(n, budget_bytes):
    """Largest row tile TM (multiple of 128 dividing N) whose working set fits."""
    best = None
    for tm in range(128, n, 128):
        if n % tm == 0 and 10 * tm * n * 4 <= budget_bytes:
            best = tm
    return best


def self_attention_pallas(w, x, xyz, pos_coef=0.1, *, row_tile=None):
    """w: (C//4, C) shared q/k 1x1-conv weight; x: (B, C, N); xyz: (B, N, 3) -> (B, N, N)."""
    b, c, n = x.shape
    c4 = w.shape[0]

    w16 = w.astype(jnp.bfloat16)
    x16 = x.astype(jnp.bfloat16)
    xyz_p = jnp.pad(xyz.astype(jnp.float32),
                    ((0, 0), (0, 0), (0, _COORD_PAD - xyz.shape[-1])))          # (B, N, 8)
    xyzt_p = jnp.transpose(xyz_p, (0, 2, 1))                                    # (B, 8, N)

    cap = _vmem_capacity_bytes()
    vmem_limit = int(0.75 * cap)
    budget = cap // 2        # working-set budget (leave room for double buffering)

    if row_tile is None:
        if 10 * n * n * 4 <= budget:          # ~10 live f32 (N, N) temporaries
            row_tile = n                      # fused single-pass path
        else:
            row_tile = _pick_row_tile(n, budget)
            if row_tile is None:
                # TODO(synk): N too large for single-pass but not a multiple of 128;
                # would need padded/ragged row tiles.
                row_tile = n

    out_shape = jax.ShapeDtypeStruct((b, n, n), jnp.float32)

    if row_tile >= n:
        kernel = functools.partial(_self_attention_single_kernel, pos_coef=pos_coef)
        return pl.pallas_call(
            kernel,
            out_shape=out_shape,
            grid_spec=pltpu.PrefetchScalarGridSpec(
                num_scalar_prefetch=0,
                grid=(b,),
                in_specs=[
                    pl.BlockSpec((c4, c), lambda i: (0, 0)),
                    pl.BlockSpec((1, c, n), lambda i: (i, 0, 0)),
                    pl.BlockSpec((1, n, _COORD_PAD), lambda i: (i, 0, 0)),
                    pl.BlockSpec((1, _COORD_PAD, n), lambda i: (i, 0, 0)),
                ],
                out_specs=pl.BlockSpec((1, n, n), lambda i: (i, 0, 0)),
            ),
            compiler_params=pltpu.CompilerParams(
                dimension_semantics=("parallel",),
                vmem_limit_bytes=vmem_limit,
            ),
        )(w16, x16, xyz_p, xyzt_p)

    assert n % row_tile == 0 and row_tile % 128 == 0, (n, row_tile)
    tm = row_tile
    nt = n // tm
    kernel = functools.partial(_self_attention_tiled_kernel, pos_coef=pos_coef)
    return pl.pallas_call(
        kernel,
        out_shape=out_shape,
        grid_spec=pltpu.PrefetchScalarGridSpec(
            num_scalar_prefetch=0,
            grid=(b, 3, nt),
            in_specs=[
                pl.BlockSpec((c4, c), lambda bi, p, i: (0, 0)),            # W (shared q/k)
                pl.BlockSpec((1, c, n), lambda bi, p, i: (bi, 0, 0)),      # x, resident/batch
                pl.BlockSpec((1, c, tm), lambda bi, p, i: (bi, 0, i)),     # x cols of row tile
                pl.BlockSpec((1, tm, _COORD_PAD), lambda bi, p, i: (bi, i, 0)),  # xyz rows
                pl.BlockSpec((1, _COORD_PAD, n), lambda bi, p, i: (bi, 0, 0)),   # xyz^T
            ],
            # Output blocks are only written in pass 2; park the window on row-tile 0
            # during passes 0/1 so each (TM, N) tile is written back to HBM exactly once.
            out_specs=pl.BlockSpec((1, tm, n), lambda bi, p, i: (bi, i * (p // 2), 0)),
            scratch_shapes=[
                pltpu.VMEM((c4, n), jnp.bfloat16),   # q = W @ x
                pltpu.VMEM((1, n), jnp.float32),     # column sums of row-softmax(corr)
                pltpu.VMEM((1, n), jnp.float32),     # column sums of local attention
                pltpu.VMEM((1, n), jnp.float32),     # per-column ||xyz||^2
                pltpu.VMEM((1, n), jnp.float32),     # 1 / column sums of dist
            ],
        ),
        compiler_params=pltpu.CompilerParams(
            dimension_semantics=("parallel", "arbitrary", "arbitrary"),
            vmem_limit_bytes=vmem_limit,
        ),
    )(w16, x16, x16, xyz_p, xyzt_p)


# --------------------------- pure-JAX reference --------------------------------

def self_attention_reference(w, x, xyz, pos_coef=0.1):
    """f32 reimplementation of the PyTorch forward (torch semantics)."""
    q = jnp.einsum("oc,bcn->bon", w, x)                         # shared-weight 1x1 conv
    corr = jnp.einsum("bon,bom->bnm", q, q)                     # bmm(q^T, q)
    att = jax.nn.softmax(corr, axis=-1)
    att = att / (1e-9 + jnp.sum(att, axis=1, keepdims=True))
    diff = xyz[:, None, :, :] - xyz[:, :, None, :]              # [b,i,j] = xyz[j]-xyz[i]
    dist = jnp.sum(diff * diff, axis=-1)
    pos_am = dist / (1e-9 + jnp.sum(dist, axis=1, keepdims=True))
    local = att * (pos_am <= pos_coef).astype(att.dtype)
    local = jax.nn.softmax(local, axis=-1)
    local = local / (1e-9 + jnp.sum(local, axis=1, keepdims=True))
    return att + local


if __name__ == "__main__":
    # Small shapes consistent with the module: B=2, C=32 channels (C//4=8), N=16 points.
    B, C, N = 2, 32, 16
    C4 = C // 4

    key = jax.random.PRNGKey(0)
    kw, kx, kp = jax.random.split(key, 3)
    bound = 1.0 / (C ** 0.5)     # Conv1d kaiming-uniform-like bound; weight stored (C//4, C)
    w = jax.random.uniform(kw, (C4, C), jnp.float32, -bound, bound)
    x = jax.random.normal(kx, (B, C, N), dtype=jnp.float32)      # context_features
    xyz = jax.random.normal(kp, (B, N, 3), dtype=jnp.float32)    # xyz1

    out = jax.block_until_ready(self_attention_pallas(w, x, xyz, pos_coef=0.1))
    assert out.shape == (B, N, N) and out.dtype == jnp.float32
    assert bool(jnp.all(jnp.isfinite(out)))

    # Loose check against the f32 torch-semantics reference (kernel uses bf16 matmul
    # operands and approximate EUP reciprocals, so allow a few percent).
    ref = self_attention_reference(w, x, xyz, pos_coef=0.1)
    ref_max = float(jnp.max(jnp.abs(ref)))
    max_diff = float(jnp.max(jnp.abs(out - ref)))
    mean_diff = float(jnp.mean(jnp.abs(out - ref)))
    assert max_diff < 0.15 * ref_max + 1e-2, max_diff
    assert mean_diff < 0.02 * ref_max + 1e-3, mean_diff

    # Exercise the row-tiled 3-pass path at a larger N and cross-check it against the
    # single-pass path (identical in-kernel numerics up to column-sum accumulation order).
    B2, C2, N2 = 2, 32, 256
    k2w, k2x, k2p = jax.random.split(jax.random.PRNGKey(1), 3)
    w2 = jax.random.uniform(k2w, (C2 // 4, C2), jnp.float32, -bound, bound)
    x2 = jax.random.normal(k2x, (B2, C2, N2), dtype=jnp.float32)
    xyz2 = jax.random.normal(k2p, (B2, N2, 3), dtype=jnp.float32)
    out_tiled = jax.block_until_ready(
        self_attention_pallas(w2, x2, xyz2, 0.01, row_tile=128))
    out_single = jax.block_until_ready(
        self_attention_pallas(w2, x2, xyz2, 0.01, row_tile=N2))
    xdiff = float(jnp.max(jnp.abs(out_tiled - out_single)))
    assert xdiff < 1e-3 * (float(jnp.max(jnp.abs(out_single))) + 1.0), xdiff

    print("KERNEL_OK")
</pallas_src>

<mosaic_0001>
module attributes {stable_mosaic.version = 11 : i64} {
  func.func @_self_attention_single_kernel(%arg0: i32, %arg1: memref<8x32xbf16, #tpu.memory_space<vmem>>, %arg2: memref<1x32x16xbf16, #tpu.memory_space<vmem>>, %arg3: memref<1x16x8xf32, #tpu.memory_space<vmem>>, %arg4: memref<1x8x16xf32, #tpu.memory_space<vmem>>, %arg5: memref<1x16x16xf32, #tpu.memory_space<vmem>>) attributes {dimension_semantics = [#tpu.dimension_semantics<parallel>], iteration_bounds = array<i64: 2>, scalar_prefetch = 0 : i64, scratch_operands = 0 : i64, tpu.core_type = #tpu.core_type<tc>, window_params = [{pipeline_mode = #tpu.pipeline_mode<synchronous>, transform_indices = @transform_0, window_bounds = array<i64: 8, 32>}, {transform_indices = @transform_1, window_bounds = array<i64: 1, 32, 16>}, {transform_indices = @transform_2, window_bounds = array<i64: 1, 16, 8>}, {transform_indices = @transform_3, window_bounds = array<i64: 1, 8, 16>}, {transform_indices = @transform_4, window_bounds = array<i64: 1, 16, 16>}]} {
    %c0 = arith.constant 0 : index
    %c0_0 = arith.constant 0 : index
    %0 = vector.load %arg1[%c0, %c0_0] : memref<8x32xbf16, #tpu.memory_space<vmem>>, vector<8x32xbf16>
    %c0_1 = arith.constant 0 : index
    %c0_2 = arith.constant 0 : index
    %c0_3 = arith.constant 0 : index
    %1 = vector.load %arg2[%c0_1, %c0_2, %c0_3] : memref<1x32x16xbf16, #tpu.memory_space<vmem>>, vector<1x32x16xbf16>
    %2 = vector.shape_cast %1 : vector<1x32x16xbf16> to vector<32x16xbf16>
    %cst = arith.constant dense<0.000000e+00> : vector<8x16xf32>
    %3 = tpu.matmul %0, %2, %cst {dimension_numbers = #tpu.dot_dimension_numbers<[1], [0], [0], [1], [0, 0, 1, 1], [], []>} : vector<8x32xbf16>, vector<32x16xbf16>, vector<8x16xf32> -> vector<8x16xf32>
    %4 = arith.truncf %3 : vector<8x16xf32> to vector<8x16xbf16>
    %cst_4 = arith.constant dense<0.000000e+00> : vector<16x16xf32>
    %5 = tpu.matmul %4, %4, %cst_4 {dimension_numbers = #tpu.dot_dimension_numbers<[0], [0], [1], [1], [0, 1, 1, 1], [], []>} : vector<8x16xbf16>, vector<8x16xbf16>, vector<16x16xf32> -> vector<16x16xf32>
    %cst_5 = arith.constant dense<0xFF800000> : vector<16xf32>
    %6 = vector.multi_reduction <maximumf>, %5, %cst_5 [1] : vector<16x16xf32> to vector<16xf32>
    %7 = vector.shape_cast %6 : vector<16xf32> to vector<16x1xf32>
    %8 = vector.broadcast %7 : vector<16x1xf32> to vector<16x16xf32>
    %9 = arith.subf %5, %8 : vector<16x16xf32>
    %10 = math.exp %9 : vector<16x16xf32>
    %cst_6 = arith.constant dense<0.000000e+00> : vector<16xf32>
    %11 = vector.multi_reduction <add>, %10, %cst_6 [1] : vector<16x16xf32> to vector<16xf32>
    %12 = vector.shape_cast %11 : vector<16xf32> to vector<16x1xf32>
    %13 = tpu.reciprocal %12 {approx = true} : vector<16x1xf32> -> vector<16x1xf32>
    %14 = vector.broadcast %13 : vector<16x1xf32> to vector<16x16xf32>
    %15 = arith.mulf %10, %14 : vector<16x16xf32>
    %cst_7 = arith.constant dense<0.000000e+00> : vector<16xf32>
    %16 = vector.multi_reduction <add>, %15, %cst_7 [0] : vector<16x16xf32> to vector<16xf32>
    %17 = vector.shape_cast %16 : vector<16xf32> to vector<1x16xf32>
    %cst_8 = arith.constant 9.99999971E-10 : f32
    %18 = vector.broadcast %cst_8 : f32 to vector<1x16xf32>
    %19 = arith.addf %18, %17 : vector<1x16xf32>
    %20 = tpu.reciprocal %19 {approx = true} : vector<1x16xf32> -> vector<1x16xf32>
    %21 = vector.broadcast %20 : vector<1x16xf32> to vector<16x16xf32>
    %22 = arith.mulf %15, %21 : vector<16x16xf32>
    %c0_9 = arith.constant 0 : index
    %c0_10 = arith.constant 0 : index
    %c0_11 = arith.constant 0 : index
    %23 = vector.load %arg4[%c0_9, %c0_10, %c0_11] : memref<1x8x16xf32, #tpu.memory_space<vmem>>, vector<1x8x16xf32>
    %24 = vector.shape_cast %23 : vector<1x8x16xf32> to vector<8x16xf32>
    %25 = arith.mulf %24, %24 : vector<8x16xf32>
    %cst_12 = arith.constant dense<0.000000e+00> : vector<16xf32>
    %26 = vector.multi_reduction <add>, %25, %cst_12 [0] : vector<8x16xf32> to vector<16xf32>
    %27 = vector.shape_cast %26 : vector<16xf32> to vector<1x16xf32>
    %cst_13 = arith.constant dense<0.000000e+00> : vector<8xf32>
    %28 = vector.multi_reduction <add>, %24, %cst_13 [1] : vector<8x16xf32> to vector<8xf32>
    %29 = vector.shape_cast %28 : vector<8xf32> to vector<8x1xf32>
    %30 = vector.broadcast %29 : vector<8x1xf32> to vector<8x16xf32>
    %31 = arith.mulf %30, %24 : vector<8x16xf32>
    %cst_14 = arith.constant dense<0.000000e+00> : vector<16xf32>
    %32 = vector.multi_reduction <add>, %31, %cst_14 [0] : vector<8x16xf32> to vector<16xf32>
    %33 = vector.shape_cast %32 : vector<16xf32> to vector<1x16xf32>
    %cst_15 = arith.constant dense<0.000000e+00> : vector<1xf32>
    %34 = vector.multi_reduction <add>, %27, %cst_15 [1] : vector<1x16xf32> to vector<1xf32>
    %35 = vector.shape_cast %34 : vector<1xf32> to vector<1x1xf32>
    %cst_16 = arith.constant 1.600000e+01 : f32
    %36 = vector.broadcast %cst_16 : f32 to vector<1x16xf32>
    %37 = arith.mulf %36, %27 : vector<1x16xf32>
    %38 = vector.broadcast %35 : vector<1x1xf32> to vector<1x16xf32>
    %39 = arith.addf %38, %37 : vector<1x16xf32>
    %cst_17 = arith.constant 2.000000e+00 : f32
    %40 = vector.broadcast %cst_17 : f32 to vector<1x16xf32>
    %41 = arith.mulf %40, %33 : vector<1x16xf32>
    %42 = arith.subf %39, %41 : vector<1x16xf32>
    %cst_18 = arith.constant 9.99999971E-10 : f32
    %43 = vector.broadcast %cst_18 : f32 to vector<1x16xf32>
    %44 = arith.addf %43, %42 : vector<1x16xf32>
    %cst_19 = arith.constant 1.000000e+00 : f32
    %45 = vector.broadcast %cst_19 : f32 to vector<1x16xf32>
    %46 = arith.divf %45, %44 : vector<1x16xf32>
    %c0_20 = arith.constant 0 : index
    %c0_21 = arith.constant 0 : index
    %c0_22 = arith.constant 0 : index
    %47 = vector.load %arg3[%c0_20, %c0_21, %c0_22] : memref<1x16x8xf32, #tpu.memory_space<vmem>>, vector<1x16x8xf32>
    %48 = vector.shape_cast %47 : vector<1x16x8xf32> to vector<16x8xf32>
    %49 = arith.mulf %48, %48 : vector<16x8xf32>
    %cst_23 = arith.constant dense<0.000000e+00> : vector<16xf32>
    %50 = vector.multi_reduction <add>, %49, %cst_23 [1] : vector<16x8xf32> to vector<16xf32>
    %51 = vector.shape_cast %50 : vector<16xf32> to vector<16x1xf32>
    %cst_24 = arith.constant dense<0.000000e+00> : vector<16x16xf32>
    %52 = tpu.matmul %48, %24, %cst_24 {dimension_numbers = #tpu.dot_dimension_numbers<[1], [0], [0], [1], [0, 0, 1, 1], [], []>} : vector<16x8xf32>, vector<8x16xf32>, vector<16x16xf32> -> vector<16x16xf32>
    %53 = vector.broadcast %51 : vector<16x1xf32> to vector<16x16xf32>
    %54 = vector.broadcast %27 : vector<1x16xf32> to vector<16x16xf32>
    %55 = arith.addf %53, %54 : vector<16x16xf32>
    %cst_25 = arith.constant 2.000000e+00 : f32
    %56 = vector.broadcast %cst_25 : f32 to vector<16x16xf32>
    %57 = arith.mulf %56, %52 : vector<16x16xf32>
    %58 = arith.subf %55, %57 : vector<16x16xf32>
    %cst_26 = arith.constant 0.000000e+00 : f32
    %59 = vector.broadcast %cst_26 : f32 to vector<16x16xf32>
    %60 = arith.maximumf %58, %59 : vector<16x16xf32>
    %61 = vector.broadcast %46 : vector<1x16xf32> to vector<16x16xf32>
    %62 = arith.mulf %60, %61 : vector<16x16xf32>
    %cst_27 = arith.constant 1.000000e-01 : f32
    %63 = vector.broadcast %cst_27 : f32 to vector<16x16xf32>
    %64 = arith.cmpf ole, %62, %63 : vector<16x16xf32>
    %cst_28 = arith.constant 0.000000e+00 : f32
    %65 = vector.broadcast %cst_28 : f32 to vector<16x16xf32>
    %66 = arith.select %64, %22, %65 : vector<16x16xi1>, vector<16x16xf32>
    %cst_29 = arith.constant dense<0xFF800000> : vector<16xf32>
    %67 = vector.multi_reduction <maximumf>, %66, %cst_29 [1] : vector<16x16xf32> to vector<16xf32>
    %68 = vector.shape_cast %67 : vector<16xf32> to vector<16x1xf32>
    %69 = vector.broadcast %68 : vector<16x1xf32> to vector<16x16xf32>
    %70 = arith.subf %66, %69 : vector<16x16xf32>
    %71 = math.exp %70 : vector<16x16xf32>
    %cst_30 = arith.constant dense<0.000000e+00> : vector<16xf32>
    %72 = vector.multi_reduction <add>, %71, %cst_30 [1] : vector<16x16xf32> to vector<16xf32>
    %73 = vector.shape_cast %72 : vector<16xf32> to vector<16x1xf32>
    %74 = tpu.reciprocal %73 {approx = true} : vector<16x1xf32> -> vector<16x1xf32>
    %75 = vector.broadcast %74 : vector<16x1xf32> to vector<16x16xf32>
    %76 = arith.mulf %71, %75 : vector<16x16xf32>
    %cst_31 = arith.constant dense<0.000000e+00> : vector<16xf32>
    %77 = vector.multi_reduction <add>, %76, %cst_31 [0] : vector<16x16xf32> to vector<16xf32>
    %78 = vector.shape_cast %77 : vector<16xf32> to vector<1x16xf32>
    %cst_32 = arith.constant 9.99999971E-10 : f32
    %79 = vector.broadcast %cst_32 : f32 to vector<1x16xf32>
    %80 = arith.addf %79, %78 : vector<1x16xf32>
    %81 = tpu.reciprocal %80 {approx = true} : vector<1x16xf32> -> vector<1x16xf32>
    %82 = vector.broadcast %81 : vector<1x16xf32> to vector<16x16xf32>
    %83 = arith.mulf %76, %82 : vector<16x16xf32>
    %84 = arith.addf %22, %83 : vector<16x16xf32>
    %c0_33 = arith.constant 0 : index
    %c0_34 = arith.constant 0 : index
    %c0_35 = arith.constant 0 : index
    %85 = vector.load %arg5[%c0_33, %c0_34, %c0_35] : memref<1x16x16xf32, #tpu.memory_space<vmem>>, vector<1x16x16xf32>
    %86 = vector.shape_cast %85 : vector<1x16x16xf32> to vector<16x16xf32>
    %87 = vector.shape_cast %84 : vector<16x16xf32> to vector<1x16x16xf32>
    tpu.vector_store %arg5[%c0_33, %c0_34, %c0_35], %87 {strides = array<i32>} : memref<1x16x16xf32, #tpu.memory_space<vmem>>, vector<1x16x16xf32>,
    return
  }
  func.func @transform_0(%arg0: i32) -> (i32, i32) {
    %c0_i32 = arith.constant 0 : i32
    %c0_i32_0 = arith.constant 0 : i32
    %c0_i32_1 = arith.constant 0 : i32
    return %c0_i32, %c0_i32_0 : i32, i32
  }
  func.func @transform_1(%arg0: i32) -> (i32, i32, i32) {
    %c0_i32 = arith.constant 0 : i32
    %c0_i32_0 = arith.constant 0 : i32
    %c0_i32_1 = arith.constant 0 : i32
    return %arg0, %c0_i32, %c0_i32_0 : i32, i32, i32
  }
  func.func @transform_2(%arg0: i32) -> (i32, i32, i32) {
    %c0_i32 = arith.constant 0 : i32
    %c0_i32_0 = arith.constant 0 : i32
    %c0_i32_1 = arith.constant 0 : i32
    return %arg0, %c0_i32, %c0_i32_0 : i32, i32, i32
  }
  func.func @transform_3(%arg0: i32) -> (i32, i32, i32) {
    %c0_i32 = arith.constant 0 : i32
    %c0_i32_0 = arith.constant 0 : i32
    %c0_i32_1 = arith.constant 0 : i32
    return %arg0, %c0_i32, %c0_i32_0 : i32, i32, i32
  }
  func.func @transform_4(%arg0: i32) -> (i32, i32, i32) {
    %c0_i32 = arith.constant 0 : i32
    %c0_i32_0 = arith.constant 0 : i32
    %c0_i32_1 = arith.constant 0 : i32
    return %arg0, %c0_i32, %c0_i32_0 : i32, i32, i32
  }
}

</mosaic_0001>

<bundles_post_ra>
// kernel: tpu_custom_call.1
= control target key start
LH: loop header
LB: loop body
LE: loop exit
PB: predicated region body
PF: predicated region fallthrough
CT: control target
= control target key end

     0   :  { %9 = vsyncpa [#allocation3], 0  ;;  %s1019_s0 = inlined_call_operand.vmem [shape: bf16[8,32], index: 0, kind: input, shape index: {}]   ;;  %s1020_s1 = inlined_call_operand.vmem [shape: bf16[2,32,16], index: 1, kind: input, shape index: {}]   ;;  %s1021_s2 = inlined_call_operand.vmem [shape: f32[2,16,8], index: 2, kind: input, shape index: {}]   ;;  %s1022_s3 = inlined_call_operand.vmem [shape: f32[2,8,16], index: 3, kind: input, shape index: {}]   ;;  %s1023_s4 = inlined_call_operand.hbm [shape: f32[2,16,16], index: 4, kind: output, shape index: {}]  }
   0x1   :  { %11 = vsyncpa [#allocation3 + $0x1], 0  ;;  %s884_s15 = smov 0   ;;  %s886_s16 = smov 0  }
   0x2   :  { %s888_s17 = smov 0   ;;  %s890_s18 = smov 0  }
   0x3 LB: > { %s905_s19 = sadd.s32 4294967295, %s852_s18   ;;  %s671_s20 = sadd.s32 4294967294, %s852_s18   ;;  %s852_s18 = sphi %s890_s18, %s1029_s18   ;;  %s848_s17 = sphi %s888_s17, %s1028_s17   ;;  %s844_s16 = sphi %s886_s16, %s1027_s16   ;;  %s840_s15 = sphi %s884_s15, %s1026_s15  }
   0x4   : > { %s909_s21 = sadd.s32 1, %s852_s18   ;;  %s123_s22 = sadd.s32 1, %s848_s17 }
   0x5   : > { %s120_s23 = ssub.s32 %s852_s18, %s909_s21  ;;  %p133_p0 = scmp.ne.s32.totalorder %s848_s17, %s844_s16 }
   0x6   : > { %p121_p1 = scmp.eq.s32.totalorder %s120_s23, 0  ;;  %p134_p2 = scmp.eq.s32.totalorder %s905_s19, 1 }
   0x7   : > { %p139_p3 = scmp.ne.s32.totalorder %s844_s16, %s840_s15  ;;  %p140_p4 = scmp.eq.s32.totalorder %s671_s20, 1 }
   0x8   : > { %s920_s24 = scalar_select %p121_p1, %s848_s17, %s123_s22  }
   0x9   : > { %p922_p5 = por %p134_p2, %p133_p0  ;;  %p926_p6 = por %p140_p4, %p139_p3 }
   0xa   : > { %p674_p7 = scmp.ge.s32.totalorder %s852_s18, 1  ;;  %p184_p8 = scmp.lt.s32.totalorder %s852_s18, 3 }
   0xc   : > { %p185_p9 = pnand %p674_p7, %p184_p8 }
   0xd   : > { %p219_p10 = scmp.lt.s32.totalorder (!%p185_p9), %s905_s19, 1  ;;  %v854_v0 = vmov (!%p185_p9), 0.0   ;;  %vm855_vm0 = vmmov (!%p185_p9), 0   ;;  %v234_v3 = vld [vmem:[%s1019_s0] sm:$0xf] (!%p185_p9)  ;;  %vm251_vm1 = vcmask (!%p185_p9), 261120  }
   0xe   : > { %188 = sbr.rel (%p185_p9) target bundleno = 1273 (0x4f9), region = 36  ;;  %703 = vmatprep.subr.bf16.mxu0 (!%p185_p9), %v854_v0  ;;  %707 = vmatprep.mubr.msk.bf16.mxu0 (!%p185_p9), %vm855_vm0, %v854_v0  ;;  %vm316_vm2 = vcmask (!%p185_p9), 1043456   ;;  %vm312_vm3 = vcmask (!%p185_p9), 64512   ;;  %vm361_vm4 = vcmask (!%p185_p9), 130048   ;;  %s216_s20 = sand.u32 (!%p185_p9), 1, %s844_s16  }
   0xf   : > { %711 = vmatprep.subr.bf16.mxu1 (!%p185_p9), %v854_v0  ;;  %713 = vmatprep.mubr.msk.bf16.mxu1 (!%p185_p9), %vm855_vm0, %v854_v0  ;;  %s675_s22 = sshll.u32 (!%p185_p9), %s216_s20, 4  ;;  %s694_s23 = sshll.u32 (!%p185_p9), %s905_s19, 8 }
  0x10   : > { %s856_s7 = smov (!%p185_p9), [#allocation2]  }
  0x15   : > { %s220_s27 = scalar_select %p219_p10, %s905_s19, 1 }
  0x16   : > { %s978_s19 = scalar_lea.sflag [#allocation3], %s216_s20 }
  0x17   : > { %s692_s28 = sshll.u32 %s220_s27, 4  ;;  %s680_s8 = sshll.u32 %s220_s27, 3 }
  0x18   : > { %s223_s5 = scalar_lea.vmem %s1020_s1, %s692_s28  ;;  %s228_s11 = scalar_lea.vmem %s1021_s2, %s692_s28 }
  0x19   : > { %v766_v1 = vld [vmem:[%s223_s5] sm:$0xff]   ;;  %v767_v2 = vld [vmem:[%s223_s5 + $0x8] sm:$0xff]   ;;  %s232_s14 = scalar_lea.vmem %s1022_s3, %s680_s8  ;;  %s218_s27 = scalar_lea.vmem [#allocation2], %s675_s22 }
  0x1a   : > { %704 = vmatpush3.bf16.msra.mxu0 %v766_v1  ;;  %v427_v11 = vld [vmem:[%s228_s11] sm:$0xff]  ;;  %v428_v13 = vld [vmem:[%s228_s11 + $0x8] sm:$0xff]  ;;  %s585_s28 = sshll.u32 %s218_s27, 4  ;;  %s972_s5 = scalar_lea.hbm %s1023_s4, %s694_s23  ;;  %s974_s28 = int_to_ptr.vmem [resolvable:$true] %s585_s28 }
  0x1b   : > { %705 = vmatprep.subr.bf16.mxu0 %v854_v0  ;;  %v397_v12 = vld [vmem:[%s232_s14] sm:$0xff]  ;;  %v429_v20 = vmul.f32 %v427_v11, %v427_v11  ;;  %v430_v42 = vmul.f32 %v428_v13, %v428_v13  ;;  %s790_s6 = scalar_lea.vmem %s974_s28, 256  ;;  %s794_s8 = sshll.u32 %s856_s7, 4  ;;  %s795_s8 = int_to_ptr.vmem [resolvable:$false] %s794_s8 }
  0x1c   : > { %v398_v22 = vmul.f32 %v397_v12, %v397_v12  ;;  %v406_v39 = vsel %vm361_vm4, %v397_v12, 0.0  ;;  %p791_p11 = scmp.ne.s32.totalorder %s974_s28, %s790_s6  ;;  %s796_s9 = scalar_lea.vmem %s795_s8, 512 }
  0x1d   : > { %v431_v21 = vsel %vm312_vm3, %v429_v20, 0.0  ;;  %v434_v43 = vsel %vm312_vm3, %v430_v42, 0.0  ;;  %p797_p0 = scmp.lt.s32.totalorder %s974_s28, %s795_s8  ;;  %p798_p1 = scmp.lt.s32.totalorder %s796_s9, %s790_s6 }
  0x1e   : > { %706 = vmatpush3.bf16.msra.mxu0 %v767_v2  ;;  %v399_v23 = vsel %vm361_vm4, %v398_v22, 0.0  ;;  %p792_p12 = pnand %p791_p11, %p922_p5 }
  0x1f   : > { %v400_v27 = vrot.slane %v399_v23, 4  ;;  %p799_p2 = por %p798_p1, %p797_p0 }
  0x20   : > { %p793_p13 = pneg %p792_p12 }
  0x21   : > { %708 = vmatmul.mubr.msk.bf16.vlgmr.msra.gmra.mrb[0].mxu0 %vm251_vm1, %v234_v3  ;;  %v401_v31 = vadd.f32 %v400_v27, %v399_v23 }
  0x22   : > { %p800_p3 = pnand %p799_p2, %p793_p13 }
  0x23   : > { %v402_v32 = vrot.slane %v401_v31, 2 }
  0x25   : > { %v403_v33 = vadd.f32 %v402_v32, %v401_v31 }
  0x27   : > { %v404_v37 = vrot.slane %v403_v33, 1 }
  0x29   : > { %v405_v40 = vadd.f32 %v404_v37, %v403_v33 }
  0x2b   : > { %v417_v41 = vsel %vm361_vm4, %v405_v40, 0.0  ;;  %v420_v59 = vmul.f32 16.0, %v405_v40 }
  0xf4   : > { %v289_v4 = vpop.f32.mrb[0].mxu0 }
  0xf5   : > { %v295_v5 = vpack.c.bf16 %v289_v4, %v289_v4  ;;  %v709_v6 = vpop.f32.mrb[1].mxu0 }
  0xf6   : > { %v292_v7 = vpop.f32.mrb[2].mxu0 }
  0xf7   : > { %296 = vxpose.xlu0.c.b16.start.end [1/1] (short) (narrow) %v295_v5, 16  ;;  %v710_v8 = vpop.f32.mrb[3].mxu0  ;;  %v318_v9 = vsel %vm316_vm2, %v295_v5, 0 }
  0xf8   : > { %712 = vmatpush3.bf16.msra.mxu1 %v318_v9 }
  0xf9   : > { %717 = vmatprep.subr.mxu1 %v397_v12 }
 0x15d   : > { %v304_v10 = vpop.trf.xlu0 }
 0x15e   : > { %714 = vmatmul.mubr.msk.bf16.vlgmr.msra.gmra.mrb[0].mxu1 %vm312_vm3, %v304_v10 }
 0x15f   : > { %719 = vmatprep.mubr.msk.f32.mxu1 %vm312_vm3, %v427_v11  ;;  %718 = vmatpush3.msra.mxu1 %v397_v12 }
 0x166   : > { %720 = vmatmul.mubr.msk.f32.vlgmr.msra.gmra.mrb[4].mxu1 %vm312_vm3, %v428_v13 }
 0x231   : > { %v354_v14 = vpop.f32.mrb[0].mxu1 }
 0x232   : > { %v715_v15 = vpop.f32.mrb[1].mxu1  ;;  %v362_v16 = vsel %vm361_vm4, %v354_v14, -inf }
 0x233   : > { %363 = vmax.xlane.f32.xlu0 %v362_v16  ;;  %v357_v17 = vpop.f32.mrb[2].mxu1 }
 0x234   : > { %v716_v18 = vpop.f32.mrb[3].mxu1  ;;  %v365_v19 = vsel %vm361_vm4, %v357_v17, -inf }
 0x235   : > { %366 = vmax.xlane.f32.xlu1 %v365_v19 }
 0x237   : > { %432 = vadd.xlane.f32.xlu0 %v431_v21 }
 0x239   : > { %v721_v44 = vpop.f32.mrb[4].mxu1 }
 0x23a   : > { %v509_v45 = vpop.f32.mrb[5].mxu1  ;;  %v521_v13 = vmul.f32 2.0, %v721_v44 }
 0x23b   : > { %v520_v16 = vmul.f32 2.0, %v509_v45 }
 0x2c0   : > { %v364_v24 = vpop.xlane.xlu0 %363 }
 0x2c1   : > { %v368_v25 = vsub.f32 %v354_v14, %v364_v24 }
 0x2c2   : > { %v367_v26 = vpop.xlane.xlu1 %366 }
 0x2c3   : > { %v370_v28 = vmul.f32 1.442695, %v368_v25  ;;  %v369_v29 = vsub.f32 %v357_v17, %v367_v26 }
 0x2c4   : > { %v433_v10 = vpop.xlane.xlu0 %432 }
 0x2c5   : > { %768 = vpow2.f32 %v370_v28  ;;  %v372_v30 = vmul.f32 1.442695, %v369_v29  ;;  %v518_v14 = vadd.f32 %v433_v10, %v405_v40 }
 0x2c7   : > { %770 = vpow2.f32 %v372_v30  ;;  %v522_v20 = vsub.f32 %v518_v14, %v520_v16 }
 0x2c9   : > { %v524_v22 = vmax.f32 %v522_v20, 0.0 }
 0x2cf   : > { %v769_v34 = vpop.eup %768 }
 0x2d0   : > { %v374_v35 = vsel %vm361_vm4, %v769_v34, 0.0 }
 0x2d1   : > { %v771_v36 = vpop.eup %770  ;;  %375 = vadd.xlane.f32.xlu1 %v374_v35 }
 0x2d2   : > { %v377_v38 = vsel %vm361_vm4, %v771_v36, 0.0 }
 0x2d5   : > { %378 = vadd.xlane.f32.xlu1 %v377_v38 }
 0x2d9   : > { %407 = vadd.xlane.f32.xlu1 %v406_v39 }
 0x2dd   : > { %418 = vadd.xlane.f32.xlu1 %v417_v41 }
 0x2e1   : > { %435 = vadd.xlane.f32.xlu1 %v434_v43 }
 0x35e   : > { %v376_v46 = vpop.xlane.xlu1 %375 }
 0x35f   : > { %772 = vrcp.f32 %v376_v46 }
 0x362   : > { %v379_v47 = vpop.xlane.xlu1 %378 }
 0x363   : > { %774 = vrcp.f32 %v379_v47 }
 0x366   : > { %v408_v48 = vpop.xlane.xlu1 %407 }
 0x367   : > { %v409_v49 = vmul.f32 %v408_v48, %v397_v12 }
 0x369   : > { %v773_v50 = vpop.eup %772  ;;  %v410_v51 = vsel %vm361_vm4, %v409_v49, 0.0 }
 0x36a   : > { %v411_v52 = vrot.slane %v410_v51, 4  ;;  %v382_v54 = vmul.f32 %v773_v50, %v769_v34  ;;  %v419_v62 = vpop.xlane.xlu1 %418 }
 0x36b   : > { %v421_v3 = vadd.f32 %v420_v59, %v419_v62 }
 0x36c   : > { %v412_v53 = vadd.f32 %v411_v52, %v410_v51  ;;  %v384_v60 = vsel %vm361_vm4, %v382_v54, 0.0 }
 0x36d   : > { %v775_v55 = vpop.eup %774 }
 0x36e   : > { %v413_v56 = vrot.slane %v412_v53, 2  ;;  %v383_v57 = vmul.f32 %v775_v55, %v771_v36  ;;  %v436_v11 = vpop.xlane.xlu1 %435 }
 0x36f   : > { %v519_v15 = vadd.f32 %v436_v11, %v405_v40 }
 0x370   : > { %v414_v58 = vadd.f32 %v413_v56, %v412_v53  ;;  %v385_v61 = vsel %vm361_vm4, %v383_v57, 0.0 }
 0x371   : > { %v386_v63 = vadd.f32 %v385_v61, %v384_v60  ;;  %v523_v19 = vsub.f32 %v519_v15, %v521_v13 }
 0x372   : > { %v415_v0 = vrot.slane %v414_v58, 1 }
 0x373   : > { %v387_v1 = vrot.slane %v386_v63, 4  ;;  %v525_v21 = vmax.f32 %v523_v19, 0.0 }
 0x374   : > { %v416_v2 = vadd.f32 %v415_v0, %v414_v58 }
 0x375   : > { %v388_v4 = vadd.f32 %v387_v1, %v386_v63 }
 0x376   : > { %v422_v5 = vmul.f32 2.0, %v416_v2 }
 0x377   : > { %v389_v6 = vrot.slane %v388_v4, 2 }
 0x378   : > { %v423_v7 = vsub.f32 %v421_v3, %v422_v5 }
 0x379   : > { %v390_v8 = vadd.f32 %v389_v6, %v388_v4 }
 0x37a   : > { %v424_v9 = vadd.f32 1e-09, %v423_v7 }
 0x37b   : > { %v391_v12 = vrot.slane %v390_v8, 1 }
 0x37c   : > { %776 = vrcp.f32 %v424_v9 }
 0x37d   : > { %v392_v17 = vadd.f32 %v391_v12, %v390_v8 }
 0x37f   : > { %v393_v18 = vadd.f32 1e-09, %v392_v17 }
 0x381   : > { %778 = vrcp.f32 %v393_v18 }
 0x386   : > { %v777_v23 = vpop.eup %776 }
 0x387   : > { %v527_v24 = vmul.f32 %v777_v23, %v525_v21  ;;  %v526_v25 = vmul.f32 %v777_v23, %v524_v22 }
 0x389   : > { %vm529_vm5 = vcmp.le.f32.partialorder %v527_v24, 0.1  ;;  %vm528_vm6 = vcmp.le.f32.partialorder %v526_v25, 0.1 }
 0x38b   : > { %v779_v26 = vpop.eup %778 }
 0x38c   : > { %v396_v27 = vmul.f32 %v779_v26, %v383_v57  ;;  %v395_v28 = vmul.f32 %v779_v26, %v382_v54 }
 0x38e   : > { %v531_v29 = vsel %vm529_vm5, %v396_v27, 0.0  ;;  %v530_v30 = vsel %vm528_vm6, %v395_v28, 0.0 }
 0x38f   : > { %v535_v31 = vsel %vm361_vm4, %v531_v29, -inf  ;;  %v532_v32 = vsel %vm361_vm4, %v530_v30, -inf }
 0x390   : > { %536 = vmax.xlane.f32.xlu1 %v535_v31  ;;  %533 = vmax.xlane.f32.xlu0 %v532_v32 }
 0x41d   : > { %v537_v33 = vpop.xlane.xlu1 %536  ;;  %v534_v34 = vpop.xlane.xlu0 %533 }
 0x41e   : > { %v539_v35 = vsub.f32 %v531_v29, %v537_v33  ;;  %v538_v36 = vsub.f32 %v530_v30, %v534_v34 }
 0x420   : > { %v542_v37 = vmul.f32 1.442695, %v539_v35  ;;  %v540_v38 = vmul.f32 1.442695, %v538_v36 }
 0x422   : > { %780 = vpow2.f32 %v542_v37 }
 0x423   : > { %782 = vpow2.f32 %v540_v38 }
 0x42c   : > { %v781_v39 = vpop.eup %780 }
 0x42d   : > { %v783_v40 = vpop.eup %782  ;;  %v547_v41 = vsel %vm361_vm4, %v781_v39, 0.0 }
 0x42e   : > { %548 = vadd.xlane.f32.xlu1 %v547_v41  ;;  %v544_v42 = vsel %vm361_vm4, %v783_v40, 0.0 }
 0x42f   : > { %545 = vadd.xlane.f32.xlu0 %v544_v42 }
 0x4bb   : > { %v549_v43 = vpop.xlane.xlu1 %548 }
 0x4bc   : > { %784 = vrcp.f32 %v549_v43  ;;  %v546_v44 = vpop.xlane.xlu0 %545 }
 0x4bd   : > { %786 = vrcp.f32 %v546_v44 }
 0x4c6   : > { %v785_v45 = vpop.eup %784 }
 0x4c7   : > { %v787_v46 = vpop.eup %786  ;;  %v553_v47 = vmul.f32 %v785_v45, %v781_v39 }
 0x4c8   : > { %v552_v48 = vmul.f32 %v787_v46, %v783_v40 }
 0x4c9   : > { %v555_v49 = vsel %vm361_vm4, %v553_v47, 0.0 }
 0x4ca   : > { %v554_v50 = vsel %vm361_vm4, %v552_v48, 0.0 }
 0x4cb   : > { %v556_v51 = vadd.f32 %v555_v49, %v554_v50 }
 0x4cd   : > { %v557_v52 = vrot.slane %v556_v51, 4 }
 0x4cf   : > { %v558_v53 = vadd.f32 %v557_v52, %v556_v51 }
 0x4d1   : > { %v559_v54 = vrot.slane %v558_v53, 2 }
 0x4d3   : > { %v560_v55 = vadd.f32 %v559_v54, %v558_v53 }
 0x4d5   : > { %v561_v56 = vrot.slane %v560_v55, 1 }
 0x4d7   : > { %v562_v57 = vadd.f32 %v561_v56, %v560_v55 }
 0x4d9   : > { %v563_v58 = vadd.f32 1e-09, %v562_v57 }
 0x4db   : > { %788 = vrcp.f32 %v563_v58 }
 0x4e5   : > { %v789_v59 = vpop.eup %788 }
 0x4e6   : > { %v565_v60 = vmul.f32 %v789_v59, %v552_v48  ;;  %v566_v61 = vmul.f32 %v789_v59, %v553_v47 }
 0x4e8   : > { %v567_v62 = vadd.f32 %v565_v60, %v395_v28  ;;  %v568_v63 = vadd.f32 %v566_v61, %v396_v27 }
 0x4ea   : > { %569 = vst.msk [vmem:[%s218_s27] sm:$0xff] %vm361_vm4, %v567_v62  ;;  %570 = vst.msk [vmem:[%s218_s27 + $0x8] sm:$0xff] %vm361_vm4, %v568_v63 }
 0x4eb   : > { %803 = shalt.err (!%p800_p3)
}
 0x4ec   : > { %s804_s10 = scalar_lea.hbm %s972_s5, 256  ;;  %s808_s13 = scalar_lea.hbm %s1023_s4, 512 }
 0x4ed   : > { %p805_p4 = scmp.ne.s32.totalorder %s972_s5, %s804_s10  ;;  %p809_p9 = scmp.lt.u32.totalorder %s972_s5, %s1023_s4 }
 0x4ee   : > { %p810_p10 = scmp.lt.u32.totalorder %s808_s13, %s804_s10  ;;  %p812_p12 = scmp.lt.u32.totalorder %s804_s10, %s972_s5 }
 0x4ef   : > { %p806_p7 = pnand %p805_p4, %p922_p5 }
 0x4f0   : > { %p811_p11 = por %p810_p10, %p809_p9 }
 0x4f1   : > { %p807_p8 = pneg %p806_p7 }
 0x4f2   : > { %p813_p13 = por %p812_p12, %p811_p11 }
 0x4f4   : > { %p814_p0 = pnand %p813_p13, %p807_p8 }
 0x4f6   : > { %817 = shalt.err (!%p814_p0)
}
 0x4f7   : > { %s857_s22 = smov 128   ;;  %s858_s23 = smov 8  }
 0x4f8   : > { %722 = dma.vmem_to_hbm [thread:$0]  (%p922_p5), %s974_s28, 256, %s972_s5, %s978_s19, %s857_s22, %s857_s22, %s858_s23  }
 0x4f9 PF: > { %p728_p1 = scmp.ge.s32.totalorder %s852_s18, 2  ;;  %s600_s27 = sand.u32 1, %s840_s15  }
 0x4fa   : > { %s601_s29 = scalar_lea.sflag [#allocation3], %s600_s27 }
 0x4fb   : > { %p725_p2 = pnand %p728_p1, %p926_p6 }
 0x4fd   : > { %835 = dma.done.wait (!%p725_p2), %s601_s29, 256  }
 0x4fe   : > { %837 = vsyncadd (!%p725_p2), %s601_s29, 4294967040  ;;  %p14_p3 = scmp.ge.s32.totalorder %s909_s21, 4   ;;  %s1026_s15 = smov %s844_s16 }
 0x4ff   : > { %s1027_s16 = smov %s848_s17  ;;  %s1028_s17 = smov %s920_s24 }
 0x500   : > { %s1029_s18 = smov %s909_s21  ;;  %16 = sbr.rel (!%p14_p3) target bundleno = 3 (0x3), region = 77 }
 0x507   :  { %606 = vsyncpa [#allocation3], 1 }
 0x508   :  { %608 = vsyncpa [#allocation3 + $0x1], 1 }

</bundles_post_ra>
